<compile_context>
chip_gen: v5e
topology: v5e:2x2
jax: 0.10.0
libtpu: 0.0.40
codegen_flags: <defaults>
</compile_context>

<pallas_src>
import jax
import jax.numpy as jnp
import numpy as np
from jax.experimental import pallas as pl
from jax.experimental.pallas import tpu as pltpu


# -----------------------------------------------------------------------------
# Kernel: folded TokenEmbedding->LLM-stand-in->MLP.linear (3 taps + const)
#         followed by the MLP head, all in transposed (feature, batch) layout.
# -----------------------------------------------------------------------------
def model_kernel(x_ref,      # (N, TB)  transposed input block (batch on lanes)
                 coef_ref,   # (5,)     SMEM: [c0, c1, c2, const, bm2]
                 w1_ref,     # (H, N)   MLP.mlp[0].weight
                 b1_ref,     # (H, 1)   MLP.mlp[0].bias (column for lane-bcast)
                 w2_ref,     # (1, H)   MLP.mlp[2].weight
                 o_ref):     # (1, TB)  lane-dense output row
    x = x_ref[...]                                   # (N, TB) f32
    c0 = coef_ref[0]
    c1 = coef_ref[1]
    c2 = coef_ref[2]
    cc = coef_ref[3]
    b2 = coef_ref[4]

    n = x.shape[0]
    # circular conv neighbours: xp[n] = x[(n-1) % N], xn[n] = x[(n+1) % N]
    xp = pltpu.roll(x, 1, axis=0)
    xn = pltpu.roll(x, n - 1, axis=0)

    # folded TokenEmbedding -> LLM stand-in -> MLP.linear  (see header)
    s = c0 * xp + c1 * x + c2 * xn + cc              # (N, TB)

    # MLP head: Linear(N,H) -> ReLU -> Linear(H,1) -> Sigmoid (transposed form)
    h = jnp.dot(w1_ref[...], s,
                preferred_element_type=jnp.float32) + b1_ref[...]   # (H, TB)
    h = jnp.maximum(h, 0.0)
    o = jnp.dot(w2_ref[...], h,
                preferred_element_type=jnp.float32) + b2            # (1, TB)
    o_ref[...] = jax.nn.sigmoid(o).astype(o_ref.dtype)


def model_forward(x_enc, params):
    """x_enc: (B, N) float32 -> (B,) float32 (mortality score per sample)."""
    wc, wllm, bllm, wlin, blin, wm1, bm1, wm2, bm2 = params
    B, N = x_enc.shape
    H = wm1.shape[1]

    # ---- wrapper-side exact fold of the linear chain (tiny, one-time) -------
    c = (wc @ wllm) @ wlin[0]                          # (3,)
    const = bllm[0] @ wlin[0] + blin[0, 0]             # scalar
    coef = jnp.stack([c[0], c[1], c[2], const, bm2[0, 0]]).astype(jnp.float32)

    # ---- layout plumbing: features on sublanes, batch on lanes --------------
    x_t = x_enc.T                                      # (N, B)
    w1t = wm1.T                                        # (H, N)
    b1c = bm1.T                                        # (H, 1)
    w2t = wm2.T                                        # (1, H)

    # batch grid over the lane axis (sharded across cores when B is large)
    tb = B if B <= 128 else 128
    if B > 128:
        assert B % 128 == 0, "for B > 128 use a multiple of 128 (lane blocks)"
    grid = (pl.cdiv(B, tb),)

    out = pl.pallas_call(
        model_kernel,
        out_shape=jax.ShapeDtypeStruct((1, B), jnp.float32),
        grid=grid,
        in_specs=[
            pl.BlockSpec((N, tb), lambda i: (0, i)),                    # x_t
            pl.BlockSpec(memory_space=pltpu.MemorySpace.SMEM),          # coef
            pl.BlockSpec((H, N), lambda i: (0, 0)),                     # w1t
            pl.BlockSpec((H, 1), lambda i: (0, 0)),                     # b1c
            pl.BlockSpec((1, H), lambda i: (0, 0)),                     # w2t
        ],
        out_specs=pl.BlockSpec((1, tb), lambda i: (0, i)),
        compiler_params=pltpu.CompilerParams(
            dimension_semantics=("parallel",)),
    )(x_t, coef, w1t, b1c, w2t)

    return out[0]          # MLP.forward's final .squeeze() -> (B,)


# -----------------------------------------------------------------------------
# Pure-JAX reference: explicit (un-folded) path mirroring the PyTorch forward
# with the same LLM stand-in. Validates both the fold and the roll direction.
# -----------------------------------------------------------------------------
def reference_forward(x_enc, params):
    wc, wllm, bllm, wlin, blin, wm1, bm1, wm2, bm2 = params
    xp = jnp.roll(x_enc, 1, axis=1)
    xn = jnp.roll(x_enc, -1, axis=1)
    enc = (xp[:, :, None] * wc[0] + x_enc[:, :, None] * wc[1]
           + xn[:, :, None] * wc[2])                          # TokenEmbedding
    dec = jnp.einsum('bnd,de->bne', enc, wllm) + bllm         # LLM stand-in
    s = jnp.sum(dec * wlin, axis=-1) + blin[0, 0]             # MLP.linear
    h = jnp.maximum(s @ wm1 + bm1, 0.0)                       # Linear+ReLU
    o = jax.nn.sigmoid(h @ wm2 + bm2)                         # Linear+Sigmoid
    return o[:, 0]


def make_params(key, n_feat, d_llm, hidden):
    ks = jax.random.split(key, 9)
    scale = 0.1
    wc   = scale * jax.random.normal(ks[0], (3, d_llm), jnp.float32)       # conv taps
    wllm = scale * jax.random.normal(ks[1], (d_llm, d_llm), jnp.float32)   # LLM stand-in
    bllm = scale * jax.random.normal(ks[2], (1, d_llm), jnp.float32)
    wlin = scale * jax.random.normal(ks[3], (1, d_llm), jnp.float32)       # Linear(d_llm,1)
    blin = scale * jax.random.normal(ks[4], (1, 1), jnp.float32)
    wm1  = scale * jax.random.normal(ks[5], (n_feat, hidden), jnp.float32) # Linear(N,H)
    bm1  = scale * jax.random.normal(ks[6], (1, hidden), jnp.float32)
    wm2  = scale * jax.random.normal(ks[7], (hidden, 1), jnp.float32)      # Linear(H,1)
    bm2  = scale * jax.random.normal(ks[8], (1, 1), jnp.float32)
    return (wc, wllm, bllm, wlin, blin, wm1, bm1, wm2, bm2)


if __name__ == "__main__":
    # small config consistent with the module:
    #   enc_in = n_features = input_size = N, llm_dim = d_llm, hidden_size = H
    B, N, D_LLM, HIDDEN = 8, 16, 64, 32

    key = jax.random.PRNGKey(0)
    k_x, k_p = jax.random.split(key)
    x_enc = jax.random.normal(k_x, (B, N), jnp.float32)   # (B, n_features)
    params = make_params(k_p, N, D_LLM, HIDDEN)

    fwd = jax.jit(model_forward)
    out = jax.block_until_ready(fwd(x_enc, params))

    ref = reference_forward(x_enc, params)
    assert out.shape == (B,)
    np.testing.assert_allclose(np.asarray(out), np.asarray(ref),
                               rtol=1e-4, atol=1e-5)

    print("KERNEL_OK")
</pallas_src>

<mosaic_0001>
module attributes {stable_mosaic.version = 11 : i64} {
  func.func @model_kernel(%arg0: i32, %arg1: memref<16x8xf32, #tpu.memory_space<vmem>>, %arg2: memref<5xf32, #tpu.memory_space<smem>>, %arg3: memref<32x16xf32, #tpu.memory_space<vmem>>, %arg4: memref<32x1xf32, #tpu.memory_space<vmem>>, %arg5: memref<1x32xf32, #tpu.memory_space<vmem>>, %arg6: memref<1x8xf32, #tpu.memory_space<vmem>>) attributes {dimension_semantics = [#tpu.dimension_semantics<parallel>], iteration_bounds = array<i64: 1>, scalar_prefetch = 0 : i64, scratch_operands = 0 : i64, tpu.core_type = #tpu.core_type<tc>, window_params = [{transform_indices = @transform_0, window_bounds = array<i64: 16, 8>}, {transform_indices = @transform_1, window_bounds = array<i64: 5>}, {pipeline_mode = #tpu.pipeline_mode<synchronous>, transform_indices = @transform_2, window_bounds = array<i64: 32, 16>}, {pipeline_mode = #tpu.pipeline_mode<synchronous>, transform_indices = @transform_3, window_bounds = array<i64: 32, 1>}, {pipeline_mode = #tpu.pipeline_mode<synchronous>, transform_indices = @transform_4, window_bounds = array<i64: 1, 32>}, {transform_indices = @transform_5, window_bounds = array<i64: 1, 8>}]} {
    %c0 = arith.constant 0 : index
    %c0_0 = arith.constant 0 : index
    %0 = vector.load %arg1[%c0, %c0_0] : memref<16x8xf32, #tpu.memory_space<vmem>>, vector<16x8xf32>
    %c0_1 = arith.constant 0 : index
    %1 = memref.load %arg2[%c0_1] : memref<5xf32, #tpu.memory_space<smem>>
    %c1 = arith.constant 1 : index
    %2 = memref.load %arg2[%c1] : memref<5xf32, #tpu.memory_space<smem>>
    %c2 = arith.constant 2 : index
    %3 = memref.load %arg2[%c2] : memref<5xf32, #tpu.memory_space<smem>>
    %c3 = arith.constant 3 : index
    %4 = memref.load %arg2[%c3] : memref<5xf32, #tpu.memory_space<smem>>
    %c4 = arith.constant 4 : index
    %5 = memref.load %arg2[%c4] : memref<5xf32, #tpu.memory_space<smem>>
    %c1_i32 = arith.constant 1 : i32
    %6 = tpu.dynamic_rotate %0 by %c1_i32 dim 0 : vector<16x8xf32>, i32 -> vector<16x8xf32>
    %c15_i32 = arith.constant 15 : i32
    %7 = tpu.dynamic_rotate %0 by %c15_i32 dim 0 : vector<16x8xf32>, i32 -> vector<16x8xf32>
    %8 = vector.broadcast %1 : f32 to vector<16x8xf32>
    %9 = arith.mulf %8, %6 : vector<16x8xf32>
    %10 = vector.broadcast %2 : f32 to vector<16x8xf32>
    %11 = arith.mulf %10, %0 : vector<16x8xf32>
    %12 = arith.addf %9, %11 : vector<16x8xf32>
    %13 = vector.broadcast %3 : f32 to vector<16x8xf32>
    %14 = arith.mulf %13, %7 : vector<16x8xf32>
    %15 = arith.addf %12, %14 : vector<16x8xf32>
    %16 = vector.broadcast %4 : f32 to vector<16x8xf32>
    %17 = arith.addf %15, %16 : vector<16x8xf32>
    %c0_2 = arith.constant 0 : index
    %c0_3 = arith.constant 0 : index
    %18 = vector.load %arg3[%c0_2, %c0_3] : memref<32x16xf32, #tpu.memory_space<vmem>>, vector<32x16xf32>
    %cst = arith.constant dense<0.000000e+00> : vector<32x8xf32>
    %19 = tpu.matmul %18, %17, %cst {dimension_numbers = #tpu.dot_dimension_numbers<[1], [0], [0], [1], [0, 0, 1, 1], [], []>} : vector<32x16xf32>, vector<16x8xf32>, vector<32x8xf32> -> vector<32x8xf32>
    %c0_4 = arith.constant 0 : index
    %c0_5 = arith.constant 0 : index
    %20 = vector.load %arg4[%c0_4, %c0_5] : memref<32x1xf32, #tpu.memory_space<vmem>>, vector<32x1xf32>
    %21 = vector.broadcast %20 : vector<32x1xf32> to vector<32x8xf32>
    %22 = arith.addf %19, %21 : vector<32x8xf32>
    %cst_6 = arith.constant 0.000000e+00 : f32
    %23 = vector.broadcast %cst_6 : f32 to vector<32x8xf32>
    %24 = arith.maximumf %22, %23 : vector<32x8xf32>
    %c0_7 = arith.constant 0 : index
    %c0_8 = arith.constant 0 : index
    %25 = vector.load %arg5[%c0_7, %c0_8] : memref<1x32xf32, #tpu.memory_space<vmem>>, vector<1x32xf32>
    %cst_9 = arith.constant dense<0.000000e+00> : vector<1x8xf32>
    %26 = tpu.matmul %25, %24, %cst_9 {dimension_numbers = #tpu.dot_dimension_numbers<[1], [0], [0], [1], [0, 0, 1, 1], [], []>} : vector<1x32xf32>, vector<32x8xf32>, vector<1x8xf32> -> vector<1x8xf32>
    %27 = vector.broadcast %5 : f32 to vector<1x8xf32>
    %28 = arith.addf %26, %27 : vector<1x8xf32>
    %29 = arith.negf %28 : vector<1x8xf32>
    %30 = math.exp %29 : vector<1x8xf32>
    %cst_10 = arith.constant 1.000000e+00 : f32
    %31 = vector.broadcast %cst_10 : f32 to vector<1x8xf32>
    %32 = arith.addf %31, %30 : vector<1x8xf32>
    %33 = arith.divf %31, %32 : vector<1x8xf32>
    %c0_11 = arith.constant 0 : index
    %c0_12 = arith.constant 0 : index
    %34 = vector.load %arg6[%c0_11, %c0_12] : memref<1x8xf32, #tpu.memory_space<vmem>>, vector<1x8xf32>
    tpu.vector_store %arg6[%c0_11, %c0_12], %33 {strides = array<i32>} : memref<1x8xf32, #tpu.memory_space<vmem>>, vector<1x8xf32>,
    return
  }
  func.func @transform_0(%arg0: i32) -> (i32, i32) {
    %c0_i32 = arith.constant 0 : i32
    %c0_i32_0 = arith.constant 0 : i32
    return %c0_i32, %arg0 : i32, i32
  }
  func.func @transform_1(%arg0: i32) -> i32 {
    %c0_i32 = arith.constant 0 : i32
    %c0_i32_0 = arith.constant 0 : i32
    return %c0_i32 : i32
  }
  func.func @transform_2(%arg0: i32) -> (i32, i32) {
    %c0_i32 = arith.constant 0 : i32
    %c0_i32_0 = arith.constant 0 : i32
    %c0_i32_1 = arith.constant 0 : i32
    return %c0_i32, %c0_i32_0 : i32, i32
  }
  func.func @transform_3(%arg0: i32) -> (i32, i32) {
    %c0_i32 = arith.constant 0 : i32
    %c0_i32_0 = arith.constant 0 : i32
    %c0_i32_1 = arith.constant 0 : i32
    return %c0_i32, %c0_i32_0 : i32, i32
  }
  func.func @transform_4(%arg0: i32) -> (i32, i32) {
    %c0_i32 = arith.constant 0 : i32
    %c0_i32_0 = arith.constant 0 : i32
    %c0_i32_1 = arith.constant 0 : i32
    return %c0_i32, %c0_i32_0 : i32, i32
  }
  func.func @transform_5(%arg0: i32) -> (i32, i32) {
    %c0_i32 = arith.constant 0 : i32
    %c0_i32_0 = arith.constant 0 : i32
    return %c0_i32, %arg0 : i32, i32
  }
}

</mosaic_0001>

<bundles_post_ra>
// kernel: model_forward.1
= control target key start
LH: loop header
LB: loop body
LE: loop exit
PB: predicated region body
PF: predicated region fallthrough
CT: control target
= control target key end

     0   :  { %10 = vsyncpa [#allocation4], 0  ;;  %s345_s0 = inlined_call_operand.vmem [shape: f32[16,8], index: 0, kind: input, shape index: {}]   ;;  %s346_s1 = inlined_call_operand.vmem [shape: f32[5], index: 1, kind: input, shape index: {}]   ;;  %s347_s2 = inlined_call_operand.vmem [shape: f32[32,16], index: 2, kind: input, shape index: {}]   ;;  %s348_s3 = inlined_call_operand.vmem [shape: f32[32,1], index: 3, kind: input, shape index: {}]   ;;  %s349_s4 = inlined_call_operand.vmem [shape: f32[1,32], index: 4, kind: input, shape index: {}]   ;;  %s350_s5 = inlined_call_operand.hbm [shape: f32[1,8], index: 5, kind: output, shape index: {}]  }
   0x1   :  { %11 = vsyncpa [#allocation3], 0  ;;  %s19_s20 = sshll.u32 %s346_s1, 4  ;;  %s270_s21 = smov [#allocation2]   ;;  %s20_s20 = int_to_ptr.vmem [resolvable:$true] %s19_s20 }
   0x2   :  { %22 = dma.vmem_to_smem %s20_s20, 16, %s270_s21, [#allocation4]  }
   0x3   :  { %266 = dma.done.wait [#allocation4], 16  }
   0x4   :  { %267 = vsyncadd [#allocation4], 4294967280 }
   0x5   :  { %33 = sfence }
   0x6   :  { %v34_v0 = vld [vmem:[%s345_s0] sm:$0xff]  ;;  %v35_v1 = vld [vmem:[%s345_s0 + $0x8] sm:$0xff]  ;;  %s36_s26 = sld [smem:[#allocation2]]  ;;  %v43_v2 = vlaneseq  ;;  %v271_v8 = vmov 0   ;;  %v76_v9 = vld [vmem:[%s348_s3 + $0x18] sm:$0xff]  ;;  %vm97_vm2 = vcmask 130048  }
   0x7   :  { %s207_s27 = sld [smem:[#allocation2 + $0x1]]  ;;  %v41_v3 = vrot.slane %v34_v0, 7  ;;  %v42_v4 = vrot.slane %v35_v1, 7  ;;  %v48_v6 = vrot.slane %v34_v0, 1  ;;  %v49_v7 = vrot.slane %v35_v1, 1  ;;  %224 = vset.pattern.permute.xlu0 %v271_v8  ;;  %225 = vset.pattern.permute.xlu1 %v271_v8  ;;  %v74_v10 = vld [vmem:[%s348_s3 + $0x8] sm:$0xff] }
   0x8   :  { %s208_s1 = sld [smem:[#allocation2 + $0x2]]  ;;  %v44_v5 = vshrl.u32 %v43_v2, 7  ;;  %94 = vperm.xlu0 %224, %v76_v9   ;;  %84 = vperm.xlu1 %225, %v74_v10   ;;  %v75_v24 = vld [vmem:[%s348_s3 + $0x10] sm:$0xff]  ;;  %v73_v25 = vld [vmem:[%s348_s3] sm:$0xff]  ;;  %v70_v33 = vld [vmem:[%s347_s2 + $0x8] sm:$0xff]  ;;  %vm145_vm3 = vcmask 261120  }
   0x9   :  { %s312_s28 = sld [smem:[#allocation2 + $0x3]]  ;;  %v72_v34 = vld [vmem:[%s347_s2 + $0x18] sm:$0xff]  ;;  %v69_v35 = vld [vmem:[%s347_s2] sm:$0xff]  ;;  %v71_v36 = vld [vmem:[%s347_s2 + $0x10] sm:$0xff]  ;;  %s197_s23 = sshll.u32 %s350_s5, 4  ;;  %vm188_vm7 = vcmask 57344   ;;  %s198_s23 = int_to_ptr.hbm [resolvable:$true] %s197_s23 }
   0xa   :  { %vm45_vm0 = vcmp.lt.s32.totalorder %v44_v5, 1  ;;  %vm50_vm1 = vcmp.lt.s32.totalorder %v44_v5, 7  ;;  %v143_v53 = vld [vmem:[%s349_s4] sm:$0x1]  ;;  %s210_s19 = sld [smem:[#allocation2 + $0x4]]  ;;  %s272_s4 = smov [#allocation5]  }
   0xb   :  { %v46_v11 = vsel %vm45_vm0, %v41_v3, %v42_v4  ;;  %v47_v12 = vsel %vm45_vm0, %v42_v4, %v41_v3  ;;  %v52_v13 = vsel %vm50_vm1, %v49_v7, %v48_v6  ;;  %v51_v15 = vsel %vm50_vm1, %v48_v6, %v49_v7  ;;  %s195_s20 = sshll.u32 %s272_s4, 4  ;;  %s196_s20 = int_to_ptr.vmem [resolvable:$true] %s195_s20 }
   0xc   :  { %v53_v14 = vstv %s36_s26 }
   0xd   :  { %v55_v16 = vmul.f32 %v53_v14, %v46_v11  ;;  %v56_v17 = vstv %s207_s27  ;;  %v54_v18 = vmul.f32 %v53_v14, %v47_v12 }
   0xe   :  { %v58_v19 = vmul.f32 %v56_v17, %v35_v1  ;;  %v61_v20 = vstv %s208_s1  ;;  %v57_v21 = vmul.f32 %v56_v17, %v34_v0 }
   0xf   :  { %v63_v22 = vmul.f32 %v61_v20, %v52_v13  ;;  %v62_v23 = vmul.f32 %v61_v20, %v51_v15  ;;  %v66_v28 = vstv %s312_s28 }
  0x10   :  { %v60_v26 = vadd.f32 %v58_v19, %v55_v16  ;;  %v59_v27 = vadd.f32 %v57_v21, %v54_v18  ;;  %89 = vperm.xlu0 %224, %v75_v24   ;;  %79 = vperm.xlu1 %225, %v73_v25   ;;  %v144_v54 = vstv %s210_s19 }
  0x12   :  { %v65_v29 = vadd.f32 %v63_v22, %v60_v26  ;;  %v64_v30 = vadd.f32 %v62_v23, %v59_v27 }
  0x14   :  { %v68_v31 = vadd.f32 %v66_v28, %v65_v29  ;;  %v67_v32 = vadd.f32 %v66_v28, %v64_v30 }
  0x16   :  { %217 = vmatpush.msra.mxu2 %v68_v31  ;;  %218 = vmatpush.msra.mxu3 %v68_v31 }
  0x17   :  { %124 = vmatpush.msra.mxu0 %v68_v31 }
  0x18   :  { %219 = vmatpush.msra.mxu2 %v67_v32  ;;  %220 = vmatpush.msra.mxu3 %v67_v32 }
  0x19   :  { %212 = vmatmul.msk.f32.vlgmr.msra.gmra.mxu2 %vm97_vm2, %v70_v33  ;;  %214 = vmatmul.msk.f32.vlgmr.msra.gmra.mxu3 %vm97_vm2, %v72_v34 }
  0x1a   :  { %125 = vmatpush.msra.mxu0 %v67_v32 }
  0x1b   :  { %211 = vmatmul.msk.f32.vlgmr.msra.gmra.mxu0 %vm97_vm2, %v69_v35 }
  0x21   :  { %213 = vmatmul.msk.f32.gmra.mxu2 %vm97_vm2, %v71_v36 }
  0x7a   :  { %v95_v37 = vpop.permute.xlu0 %94  ;;  %v85_v38 = vpop.permute.xlu1 %84 }
  0x82   :  { %v90_v43 = vpop.permute.xlu0 %89  ;;  %v80_v44 = vpop.permute.xlu1 %79 }
  0x98   :  { %v127_v45 = vpop.f32.mrf.mxu0 }
  0x99   :  { %v128_v49 = vadd.f32 %v127_v45, %v80_v44 }
  0x9b   :  { %v139_v52 = vmax.f32 %v128_v49, 0.0 }
  0x9c   :  { %v130_v39 = vpop.f32.mrf.mxu2  ;;  %v136_v40 = vpop.f32.mrf.mxu3 }
  0x9d   :  { %v137_v41 = vadd.f32 %v136_v40, %v95_v37  ;;  %v131_v47 = vadd.f32 %v130_v39, %v85_v38 }
  0x9f   :  { %v142_v42 = vmax.f32 %v137_v41, 0.0  ;;  %v140_v51 = vmax.f32 %v131_v47, 0.0 }
  0xa1   :  { %161 = vmatpush.msra.mxu1 %v142_v42 }
  0xa4   :  { %v133_v46 = vpop.f32.mrf.mxu2 }
  0xa5   :  { %v134_v48 = vadd.f32 %v133_v46, %v90_v43 }
  0xa7   :  { %v141_v50 = vmax.f32 %v134_v48, 0.0 }
  0xa9   :  { %162 = vmatpush.msra.mxu1 %v141_v50 }
  0xab   :  { %163 = vmatpush.msra.mxu1 %v140_v51 }
  0xad   :  { %164 = vmatpush.msra.mxu1 %v139_v52 }
  0xae   :  { %215 = vmatmul.msk.f32.vlgmr.msra.gmra.mxu1 %vm145_vm3, %v143_v53 }
 0x12b   :  { %v166_v55 = vpop.f32.mrf.mxu1 }
 0x12c   :  { %v167_v56 = vadd.f32 %v166_v55, %v144_v54 }
 0x12e   :  { %v216_v57 = vmul.f32 -1.442695, %v167_v56 }
 0x130   :  { %226 = vpow2.f32 %v216_v57 }
 0x136   :  { %v227_v58 = vpop.eup %226 }
 0x137   :  { %v172_v59 = vadd.f32 1.0, %v227_v58 }
 0x139   :  { %228 = vrcp.f32 %v172_v59  ;;  %v184_v63 = vand.u32 2147483648, %v172_v59  ;;  %v182_v1 = vand.u32 2147483647, %v172_v59  ;;  %vm178_vm5 = vweird.f32 %v172_v59 }
 0x13b   :  { %v185_v3 = vor.u32 1.1754944e-38, %v184_v63  ;;  %vm183_vm8 = vcmp.eq.f32.partialorder %v182_v1, 8.507059e+37 }
 0x13f   :  { %v229_v60 = vpop.eup %228 }
 0x140   :  { %v174_v61 = vmul.f32 %v229_v60, %v172_v59  ;;  %vm179_vm4 = vweird.f32 %v229_v60 }
 0x141   :  { %vm180_vm6 = vmor %vm178_vm5, %vm179_vm4 }
 0x142   :  { %v175_v62 = vsub.f32 1.0, %v174_v61 }
 0x144   :  { %v176_v0 = vmul.f32 %v229_v60, %v175_v62 }
 0x146   :  { %v177_v2 = vadd.f32 %v229_v60, %v176_v0 }
 0x148   :  { %v181_v4 = vsel %vm180_vm6, %v229_v60, %v177_v2 }
 0x149   :  { %v186_v5 = vsel %vm183_vm8, %v185_v3, %v181_v4 }
 0x14a   :  { %189 = vst.msk [vmem:[#allocation5] sm:$0x1] %vm188_vm7, %v186_v5 }
 0x14b   :  { %200 = dma.vmem_to_hbm [thread:$0]  %s196_s20, 16, %s198_s23, [#allocation3]  }
 0x14c   :  { %268 = dma.done.wait [#allocation3], 16  }
 0x14d   :  { %269 = vsyncadd [#allocation3], 4294967280 }
 0x14e   :  { %205 = vsyncpa [#allocation3], 1 }
 0x14f   :  { %206 = vsyncpa [#allocation4], 1 }

</bundles_post_ra>
